<compile_context>
chip_gen: v6e
topology: v6e:2x2x1
jax: 0.10.0
libtpu: 0.0.40
codegen_flags: <defaults>
</compile_context>

<pallas_src>
import functools

import jax
import jax.numpy as jnp
from jax.experimental import pallas as pl
from jax.experimental.pallas import tpu as pltpu

ALPHA = 0.25
GAMMA = 2.0

LANES = 128
# 2048x128 f32 = 1 MiB per input block; 2 inputs x 2 pipeline buffers = 4 MiB
# plus a 4 KiB accumulator per shard: comfortably inside the scoped-VMEM
# default on every generation (16 MiB v5e, 32 MiB v6e/v7x).
MAX_TILE_ROWS = 2048

# Loss-neutral padding: logit=+30, target=1 => bce = log1p(e^-30) ~ 9e-14 and
# (1 - pt) underflows to 0 in f32, so the padded elements contribute exactly 0.
_PAD_LOGIT = 30.0
_PAD_TARGET = 1.0


def _round_up(a, b):
    return ((a + b - 1) // b) * b


def _focal_loss_kernel(logits_ref, targets_ref, out_ref, *,
                       alpha, gamma, tile_rows, steps_per_shard, num_shards,
                       valid_rows_last, needs_row_mask):
    i = pl.program_id(1)   # reduction step within the shard (arbitrary)

    # The (8, 128) output block of shard `s` is revisited for every `i`, so it
    # is a resident accumulator: zero it on the shard's first step.
    @pl.when(i == 0)
    def _():
        out_ref[...] = jnp.zeros_like(out_ref)

    x = logits_ref[...].astype(jnp.float32)
    t = targets_ref[...].astype(jnp.float32)

    # Share one exp(-|x|) between the stable BCE tail and the sigmoid:
    #   bce        = max(x, 0) - x*t + log1p(e)        (== BCEWithLogits)
    #   sigmoid(x) = 1/(1+e)  if x >= 0  else  e/(1+e)
    e = jnp.exp(-jnp.abs(x))
    bce = jnp.maximum(x, 0.0) - x * t + jnp.log1p(e)
    # EUP reciprocal instead of a full f32 divide (VALU is the tight slot).
    inv = pl.reciprocal(1.0 + e, approx=True)
    p = jnp.where(x >= 0.0, inv, e * inv)

    pt = t * p + (1.0 - t) * (1.0 - p)
    one_minus_pt = 1.0 - pt
    if gamma == 2.0:
        # gamma is statically 2.0: two VPU multiplies instead of an EUP pow.
        focal = one_minus_pt * one_minus_pt
    else:
        focal = jnp.power(one_minus_pt, gamma)
    loss = alpha * focal * bce

    def accumulate(v):
        # Fold the sublane axis 8-way (pure VPU vreg adds; layout-preserving
        # reshape) and add into the tiny per-shard accumulator block.
        out_ref[...] += v.reshape(tile_rows // 8, 8, LANES).sum(axis=0)

    if needs_row_mask:
        # Only the single ragged last tile pays for the row mask; every other
        # step takes the unmasked fast path.
        is_last = (pl.program_id(0) == num_shards - 1) & (i == steps_per_shard - 1)

        @pl.when(jnp.logical_not(is_last))
        def _():
            accumulate(loss)

        @pl.when(is_last)
        def _():
            rid = jax.lax.broadcasted_iota(jnp.int32, (tile_rows, LANES), 0)
            accumulate(jnp.where(rid < valid_rows_last, loss, 0.0))
    else:
        accumulate(loss)


def focal_loss(logits, targets, alpha=ALPHA, gamma=GAMMA):
    """Mean binary focal loss over all elements, computed in a Pallas TPU kernel."""
    assert logits.shape == targets.shape
    n = int(logits.size)
    assert n > 0

    # Targets may arrive as bf16/int8/bool from the producer (the kernel
    # upcasts per tile); do NOT cast here -- that would add a full HBM copy.
    flat_l = logits.reshape(-1)
    flat_t = targets.reshape(-1)

    rem = n % LANES
    if rem:
        # Rare path: pad only up to the next lane multiple (<128 elements) with
        # loss-neutral values so no element-level mask is needed in the kernel.
        # TODO(synk): this still materializes one copy of the flattened inputs;
        # a rectangular (rows, 128) view is impossible otherwise.
        pad = LANES - rem
        flat_l = jnp.pad(flat_l, (0, pad), constant_values=_PAD_LOGIT)
        flat_t = jnp.pad(flat_t, (0, pad), constant_values=_PAD_TARGET)

    rows = flat_l.size // LANES
    tile_rows = min(MAX_TILE_ROWS, _round_up(rows, 8))
    steps = -(-rows // tile_rows)
    # Two shards on the leading "parallel" axis only when they divide the work
    # evenly (so no fully out-of-bounds tiles exist).  With the 4 KiB
    # accumulator the extra shard is essentially free on single-TC chips.
    # TODO(synk): switch this axis to CORE_PARALLEL once both v7x TensorCores
    # are confirmed idle under plain "parallel".
    num_shards = 2 if (steps >= 2 and steps % 2 == 0) else 1
    steps_per_shard = steps // num_shards
    valid_rows_last = rows - (steps - 1) * tile_rows
    needs_row_mask = valid_rows_last != tile_rows

    l2d = flat_l.reshape(rows, LANES)
    t2d = flat_t.reshape(rows, LANES)

    kernel = functools.partial(
        _focal_loss_kernel,
        alpha=float(alpha),
        gamma=float(gamma),
        tile_rows=tile_rows,
        steps_per_shard=steps_per_shard,
        num_shards=num_shards,
        valid_rows_last=valid_rows_last,
        needs_row_mask=needs_row_mask,
    )

    in_map = lambda s, i: (s * steps_per_shard + i, 0)

    partial_sums = pl.pallas_call(
        kernel,
        out_shape=jax.ShapeDtypeStruct((num_shards * 8, LANES), jnp.float32),
        grid_spec=pltpu.PrefetchScalarGridSpec(
            num_scalar_prefetch=0,
            grid=(num_shards, steps_per_shard),
            in_specs=[
                pl.BlockSpec((tile_rows, LANES), in_map),
                pl.BlockSpec((tile_rows, LANES), in_map),
            ],
            # Same (8,128) block for every inner step => resident accumulator.
            out_specs=pl.BlockSpec((8, LANES), lambda s, i: (s, 0)),
        ),
        compiler_params=pltpu.CompilerParams(
            dimension_semantics=("parallel", "arbitrary"),
        ),
    )(l2d, t2d)

    # Final cross-lane / cross-shard reduction + mean: one tiny XLA reduce.
    return jnp.sum(partial_sums) / n


def focal_loss_ref(logits, targets, alpha=ALPHA, gamma=GAMMA):
    x = logits.astype(jnp.float32)
    t = targets.astype(jnp.float32)
    bce = jnp.maximum(x, 0.0) - x * t + jnp.log1p(jnp.exp(-jnp.abs(x)))
    p = jax.nn.sigmoid(x)
    pt = t * p + (1.0 - t) * (1.0 - p)
    return jnp.mean(alpha * (1.0 - pt) ** gamma * bce)


if __name__ == "__main__":
    key = jax.random.PRNGKey(0)
    k_logits, k_targets = jax.random.split(key)

    # NCHW-shaped inputs (B=2, C=4, H=16, W=16); targets are binary {0, 1}.
    shape = (2, 4, 16, 16)
    logits = jax.random.normal(k_logits, shape, dtype=jnp.float32) * 2.0
    targets = jax.random.bernoulli(k_targets, p=0.3, shape=shape).astype(jnp.float32)

    out = focal_loss(logits, targets)
    out = jax.block_until_ready(out)

    ref = focal_loss_ref(logits, targets)
    # Tolerance allows for the approximate EUP reciprocal used for sigmoid.
    assert jnp.allclose(out, ref, rtol=2e-3, atol=1e-6), (out, ref)

    # TODO(synk): the module uses a flat `alpha` factor (matches the given
    # PyTorch forward exactly); torchvision's sigmoid_focal_loss would instead
    # use alpha_t = alpha*t + (1-alpha)*(1-t).

    print("KERNEL_OK")
</pallas_src>

<mosaic_0001>
module attributes {stable_mosaic.version = 11 : i64} {
  func.func @_focal_loss_kernel(%arg0: i32, %arg1: i32, %arg2: memref<16x128xf32, #tpu.memory_space<vmem>>, %arg3: memref<16x128xf32, #tpu.memory_space<vmem>>, %arg4: memref<8x128xf32, #tpu.memory_space<vmem>>) attributes {dimension_semantics = [#tpu.dimension_semantics<parallel>, #tpu.dimension_semantics<arbitrary>], iteration_bounds = array<i64: 1, 1>, scalar_prefetch = 0 : i64, scratch_operands = 0 : i64, tpu.core_type = #tpu.core_type<tc>, window_params = [{transform_indices = @transform_0, window_bounds = array<i64: 16, 128>}, {transform_indices = @transform_1, window_bounds = array<i64: 16, 128>}, {transform_indices = @transform_2, window_bounds = array<i64: 8, 128>}]} {
    %c0_i32 = arith.constant 0 : i32
    %0 = arith.cmpi eq, %arg1, %c0_i32 : i32
    %1 = arith.extui %0 : i1 to i32
    %c0_i32_0 = arith.constant 0 : i32
    %2 = arith.cmpi ne, %1, %c0_i32_0 : i32
    scf.if %2 {
      %cst_16 = arith.constant 0.000000e+00 : f32
      %40 = vector.broadcast %cst_16 : f32 to vector<8x128xf32>
      %c0_17 = arith.constant 0 : index
      %c0_18 = arith.constant 0 : index
      %41 = vector.load %arg4[%c0_17, %c0_18] : memref<8x128xf32, #tpu.memory_space<vmem>>, vector<8x128xf32>
      tpu.vector_store %arg4[%c0_17, %c0_18], %40 {strides = array<i32>} : memref<8x128xf32, #tpu.memory_space<vmem>>, vector<8x128xf32>,
    } else {
    }
    %c0 = arith.constant 0 : index
    %c0_1 = arith.constant 0 : index
    %3 = vector.load %arg2[%c0, %c0_1] : memref<16x128xf32, #tpu.memory_space<vmem>>, vector<16x128xf32>
    %c0_2 = arith.constant 0 : index
    %c0_3 = arith.constant 0 : index
    %4 = vector.load %arg3[%c0_2, %c0_3] : memref<16x128xf32, #tpu.memory_space<vmem>>, vector<16x128xf32>
    %5 = math.absf %3 : vector<16x128xf32>
    %cst = arith.constant 0.000000e+00 : f32
    %6 = vector.broadcast %cst : f32 to vector<16x128xf32>
    %7 = arith.subf %6, %5 : vector<16x128xf32>
    %8 = math.exp %7 : vector<16x128xf32>
    %cst_4 = arith.constant 0.000000e+00 : f32
    %9 = vector.broadcast %cst_4 : f32 to vector<16x128xf32>
    %10 = arith.maximumf %3, %9 : vector<16x128xf32>
    %11 = arith.mulf %3, %4 : vector<16x128xf32>
    %12 = arith.subf %10, %11 : vector<16x128xf32>
    %13 = math.log1p %8 : vector<16x128xf32>
    %14 = arith.addf %12, %13 : vector<16x128xf32>
    %cst_5 = arith.constant 1.000000e+00 : f32
    %15 = vector.broadcast %cst_5 : f32 to vector<16x128xf32>
    %16 = arith.addf %15, %8 : vector<16x128xf32>
    %17 = tpu.reciprocal %16 {approx = true} : vector<16x128xf32> -> vector<16x128xf32>
    %cst_6 = arith.constant 0.000000e+00 : f32
    %18 = vector.broadcast %cst_6 : f32 to vector<16x128xf32>
    %19 = arith.cmpf oge, %3, %18 : vector<16x128xf32>
    %20 = arith.mulf %8, %17 : vector<16x128xf32>
    %21 = arith.select %19, %17, %20 : vector<16x128xi1>, vector<16x128xf32>
    %22 = arith.mulf %4, %21 : vector<16x128xf32>
    %cst_7 = arith.constant 1.000000e+00 : f32
    %23 = vector.broadcast %cst_7 : f32 to vector<16x128xf32>
    %24 = arith.subf %23, %4 : vector<16x128xf32>
    %cst_8 = arith.constant 1.000000e+00 : f32
    %25 = vector.broadcast %cst_8 : f32 to vector<16x128xf32>
    %26 = arith.subf %25, %21 : vector<16x128xf32>
    %27 = arith.mulf %24, %26 : vector<16x128xf32>
    %28 = arith.addf %22, %27 : vector<16x128xf32>
    %cst_9 = arith.constant 1.000000e+00 : f32
    %29 = vector.broadcast %cst_9 : f32 to vector<16x128xf32>
    %30 = arith.subf %29, %28 : vector<16x128xf32>
    %31 = arith.mulf %30, %30 : vector<16x128xf32>
    %cst_10 = arith.constant 2.500000e-01 : f32
    %32 = vector.broadcast %cst_10 : f32 to vector<16x128xf32>
    %33 = arith.mulf %32, %31 : vector<16x128xf32>
    %34 = arith.mulf %33, %14 : vector<16x128xf32>
    %c0_11 = arith.constant 0 : index
    %c0_12 = arith.constant 0 : index
    %35 = vector.load %arg4[%c0_11, %c0_12] : memref<8x128xf32, #tpu.memory_space<vmem>>, vector<8x128xf32>
    %36 = vector.shape_cast %34 : vector<16x128xf32> to vector<2x8x128xf32>
    %cst_13 = arith.constant dense<0.000000e+00> : vector<8x128xf32>
    %37 = vector.multi_reduction <add>, %36, %cst_13 [0] : vector<2x8x128xf32> to vector<8x128xf32>
    %38 = arith.addf %35, %37 : vector<8x128xf32>
    %c0_14 = arith.constant 0 : index
    %c0_15 = arith.constant 0 : index
    %39 = vector.load %arg4[%c0_14, %c0_15] : memref<8x128xf32, #tpu.memory_space<vmem>>, vector<8x128xf32>
    tpu.vector_store %arg4[%c0_14, %c0_15], %38 {strides = array<i32>} : memref<8x128xf32, #tpu.memory_space<vmem>>, vector<8x128xf32>,
    return
  }
  func.func @transform_0(%arg0: i32, %arg1: i32) -> (i32, i32) {
    %c1_i32 = arith.constant 1 : i32
    %0 = arith.muli %arg0, %c1_i32 : i32
    %1 = arith.addi %0, %arg1 : i32
    %c0_i32 = arith.constant 0 : i32
    %c0_i32_0 = arith.constant 0 : i32
    return %1, %c0_i32 : i32, i32
  }
  func.func @transform_1(%arg0: i32, %arg1: i32) -> (i32, i32) {
    %c1_i32 = arith.constant 1 : i32
    %0 = arith.muli %arg0, %c1_i32 : i32
    %1 = arith.addi %0, %arg1 : i32
    %c0_i32 = arith.constant 0 : i32
    %c0_i32_0 = arith.constant 0 : i32
    return %1, %c0_i32 : i32, i32
  }
  func.func @transform_2(%arg0: i32, %arg1: i32) -> (i32, i32) {
    %c0_i32 = arith.constant 0 : i32
    %c0_i32_0 = arith.constant 0 : i32
    return %arg0, %c0_i32 : i32, i32
  }
}

</mosaic_0001>

<bundles_post_ra>
// kernel: tpu_custom_call.1
= control target key start
LH: loop header
LB: loop body
LE: loop exit
PB: predicated region body
PF: predicated region fallthrough
CT: control target
= control target key end

     0   :  { %7 = vsyncpa [#allocation3], 0  ;;  %s256_s0 = inlined_call_operand.hbm [shape: f32[16,128], index: 0, kind: input, shape index: {}]   ;;  %s257_s1 = inlined_call_operand.hbm [shape: f32[16,128], index: 1, kind: input, shape index: {}]   ;;  %s258_s2 = inlined_call_operand.hbm [shape: f32[8,128], index: 2, kind: output, shape index: {}]  }
   0x1   :  { %8 = vsyncpa [#allocation6], 0 }
   0x2   :  { %9 = vsyncpa [#allocation4], 0  ;;  %s227_s9 = smov [#allocation2]  }
   0x3   :  { %s19_s10 = sshll.u32 %s227_s9, 4  ;;  %s20_s10 = int_to_ptr.vmem [resolvable:$true] %s19_s10 }
   0x4   :  { %s169_s11 = scalar_lea.vmem %s20_s10, 256  ;;  %p174_p1 = scmp.lt.s32.totalorder %s20_s10, %s20_s10 }
   0x5   :  { %p170_p0 = scmp.ne.s32.totalorder %s20_s10, %s169_s11  ;;  %p175_p2 = scmp.lt.s32.totalorder %s169_s11, %s169_s11 }
   0x7   :  { %p176_p3 = por %p175_p2, %p174_p1 }
   0x9   :  { %p177_p4 = pnand %p176_p3, %p170_p0 }
   0xb   :  { %180 = shalt.err (!%p177_p4)
}
   0xc   :  { %s228_s12 = smov 128   ;;  %s229_s13 = smov 8  }
   0xd   :  { %25 = dma.hbm_to_vmem [thread:$0]  %s256_s0, 256, %s20_s10, [#allocation3], %s228_s12, %s228_s12, %s229_s13  }
   0xe   :  { %s230_s16 = smov [#allocation5]  }
   0xf   :  { %s35_s17 = sshll.u32 %s230_s16, 4  ;;  %s36_s17 = int_to_ptr.vmem [resolvable:$true] %s35_s17 }
  0x10   :  { %s189_s18 = scalar_lea.vmem %s36_s17, 256  ;;  %p194_p6 = scmp.lt.s32.totalorder %s36_s17, %s36_s17 }
  0x11   :  { %p190_p5 = scmp.ne.s32.totalorder %s36_s17, %s189_s18  ;;  %p195_p7 = scmp.lt.s32.totalorder %s189_s18, %s189_s18 }
  0x13   :  { %p196_p8 = por %p195_p7, %p194_p6 }
  0x15   :  { %p197_p9 = pnand %p196_p8, %p190_p5 }
  0x17   :  { %200 = shalt.err (!%p197_p9)
}
  0x18   :  { %41 = dma.hbm_to_vmem [thread:$0]  %s257_s1, 256, %s36_s17, [#allocation6], %s228_s12, %s228_s12, %s229_s13  }
  0x19   :  { %221 = dma.done.wait [#allocation3], 256  }
  0x1a   :  { %222 = vsyncadd [#allocation3], 4294967040 }
  0x1b   :  { %223 = dma.done.wait [#allocation6], 256  }
  0x1c   :  { %224 = vsyncadd [#allocation6], 4294967040  ;;  %v57_v0 = vld [vmem:[#allocation2] sm:$0xff]  ;;  %v58_v1 = vld [vmem:[#allocation2 + $0x8] sm:$0xff]  ;;  %s231_s0 = smov [#allocation7]  }
  0x1d   :  { %v61_v2 = vand.u32 2147483647, %v57_v0  ;;  %v62_v3 = vand.u32 2147483647, %v58_v1  ;;  %v59_v14 = vld [vmem:[#allocation5] sm:$0xff]  ;;  %v60_v16 = vld [vmem:[#allocation5 + $0x8] sm:$0xff] }
  0x1e   :  { %v69_v17 = vmax.f32 %v57_v0, 0.0  ;;  %vm99_vm0 = vcmp.ge.f32.partialorder %v57_v0, 0.0  ;;  %v71_v19 = vmul.f32 %v59_v14, %v57_v0  ;;  %vm100_vm1 = vcmp.ge.f32.partialorder %v58_v1, 0.0  ;;  %s133_s1 = sshll.u32 %s231_s0, 4  ;;  %s134_s1 = int_to_ptr.vmem [resolvable:$true] %s133_s1 }
  0x1f   :  { %v63_v4 = vsub.f32 0.0, %v61_v2  ;;  %v64_v5 = vsub.f32 0.0, %v62_v3  ;;  %v107_v26 = vsub.f32 1.0, %v59_v14  ;;  %v70_v28 = vmax.f32 %v58_v1, 0.0  ;;  %s201_s21 = scalar_lea.vmem %s134_s1, 128  ;;  %p206_p11 = scmp.lt.s32.totalorder %s134_s1, %s134_s1 }
  0x20   :  { %v108_v31 = vsub.f32 1.0, %v60_v16  ;;  %v72_v32 = vmul.f32 %v60_v16, %v58_v1  ;;  %v73_v44 = vsub.f32 %v69_v17, %v71_v19  ;;  %p202_p10 = scmp.ne.s32.totalorder %s134_s1, %s201_s21  ;;  %p207_p12 = scmp.lt.s32.totalorder %s201_s21, %s201_s21 }
  0x21   :  { %v65_v6 = vmul.f32 1.442695, %v63_v4  ;;  %v67_v7 = vmul.f32 1.442695, %v64_v5 }
  0x22   :  { %v74_v46 = vsub.f32 %v70_v28, %v72_v32  ;;  %p208_p13 = por %p207_p12, %p206_p11 }
  0x23   :  { %149 = vpow2.f32 %v65_v6 }
  0x24   :  { %151 = vpow2.f32 %v67_v7  ;;  %p209_p0 = pnand %p208_p13, %p202_p10 }
  0x30   :  { %v150_v8 = vpop.eup %149 }
  0x31   :  { %v152_v9 = vpop.eup %151  ;;  %v75_v10 = vadd.f32 1.0, %v150_v8  ;;  %v78_v12 = vmul.f32 -0.5, %v150_v8  ;;  %v81_v23 = vand.u32 2147483647, %v150_v8 }
  0x32   :  { %v84_v11 = vadd.f32 1.0, %v152_v9  ;;  %v87_v13 = vmul.f32 -0.5, %v152_v9  ;;  %v90_v29 = vand.u32 2147483647, %v152_v9 }
  0x33   :  { %153 = vrcp.f32 %v75_v10  ;;  %v79_v20 = vadd.f32 1.0, %v78_v12  ;;  %vm82_vm2 = vcmp.lt.f32.partialorder %v81_v23, 0.0004427343 }
  0x34   :  { %155 = vrcp.f32 %v84_v11  ;;  %v88_v24 = vadd.f32 1.0, %v87_v13  ;;  %vm91_vm3 = vcmp.lt.f32.partialorder %v90_v29, 0.0004427343 }
  0x35   :  { %157 = vlog2.f32 %v75_v10  ;;  %v80_v37 = vmul.f32 %v150_v8, %v79_v20 }
  0x36   :  { %159 = vlog2.f32 %v84_v11  ;;  %v89_v41 = vmul.f32 %v152_v9, %v88_v24 }
  0x40   :  { %v154_v15 = vpop.eup %153 }
  0x41   :  { %v156_v18 = vpop.eup %155  ;;  %v101_v21 = vmul.f32 %v154_v15, %v150_v8 }
  0x42   :  { %v158_v22 = vpop.eup %157  ;;  %v102_v25 = vmul.f32 %v156_v18, %v152_v9 }
  0x43   :  { %v160_v27 = vpop.eup %159  ;;  %v103_v30 = vsel %vm99_vm0, %v154_v15, %v101_v21  ;;  %v77_v36 = vmul.f32 0.6931472, %v158_v22 }
  0x44   :  { %v104_v33 = vsel %vm100_vm1, %v156_v18, %v102_v25  ;;  %v105_v34 = vmul.f32 %v103_v30, %v59_v14  ;;  %v109_v35 = vsub.f32 1.0, %v103_v30  ;;  %v86_v40 = vmul.f32 0.6931472, %v160_v27 }
  0x45   :  { %v106_v38 = vmul.f32 %v104_v33, %v60_v16  ;;  %v110_v39 = vsub.f32 1.0, %v104_v33  ;;  %v83_v47 = vsel %vm82_vm2, %v80_v37, %v77_v36 }
  0x46   :  { %v111_v42 = vmul.f32 %v109_v35, %v107_v26  ;;  %v92_v49 = vsel %vm91_vm3, %v89_v41, %v86_v40  ;;  %v93_v52 = vadd.f32 %v83_v47, %v73_v44 }
  0x47   :  { %v112_v43 = vmul.f32 %v110_v39, %v108_v31  ;;  %v94_v54 = vadd.f32 %v92_v49, %v74_v46 }
  0x48   :  { %v113_v45 = vadd.f32 %v111_v42, %v105_v34 }
  0x49   :  { %v114_v48 = vadd.f32 %v112_v43, %v106_v38 }
  0x4a   :  { %v115_v50 = vsub.f32 1.0, %v113_v45 }
  0x4b   :  { %v116_v51 = vsub.f32 1.0, %v114_v48 }
  0x4c   :  { %v117_v53 = vmul.f32 %v115_v50, %v115_v50 }
  0x4d   :  { %v118_v55 = vmul.f32 %v116_v51, %v116_v51 }
  0x4e   :  { %v119_v56 = vmul.f32 0.25, %v117_v53 }
  0x4f   :  { %v120_v57 = vmul.f32 0.25, %v118_v55 }
  0x50   :  { %v121_v58 = vmul.f32 %v119_v56, %v93_v52 }
  0x51   :  { %v122_v59 = vmul.f32 %v120_v57, %v94_v54 }
  0x53   :  { %v124_v60 = vadd.f32 %v122_v59, %v121_v58 }
  0x55   :  { %126 = vst [vmem:[#allocation7] sm:$0xff] %v124_v60 }
  0x56   :  { %212 = shalt.err (!%p209_p0)
}
  0x57   :  { %136 = dma.vmem_to_hbm [thread:$0]  %s134_s1, 128, %s258_s2, [#allocation4]  }
  0x58   :  { %225 = dma.done.wait [#allocation4], 128  }
  0x59   :  { %226 = vsyncadd [#allocation4], 4294967168 }
  0x5a   :  { %140 = vsyncpa [#allocation3], 1 }
  0x5b   :  { %141 = vsyncpa [#allocation6], 1 }
  0x5c   :  { %142 = vsyncpa [#allocation4], 1 }

</bundles_post_ra>
